<compile_context>
chip_gen: v6e
topology: v6e:2x2x1
jax: 0.10.0
libtpu: 0.0.40
codegen_flags: <defaults>
</compile_context>

<pallas_src>
import functools

import jax
import jax.numpy as jnp
from jax.experimental import pallas as pl
from jax.experimental.pallas import tpu as pltpu


def critic_kernel(s_ref, a_ref, w1s_ref, w1a_ref, b1_ref, w2_ref, b2_ref,
                  wq_ref, bq_ref, q_ref):
    # fc1 (split across state/action to fuse the concat) + ReLU.  MXU matmuls
    # accumulate in f32 regardless of operand dtype.
    h1 = jnp.dot(s_ref[...], w1s_ref[...], preferred_element_type=jnp.float32)
    h1 = h1 + jnp.dot(a_ref[...], w1a_ref[...],
                      preferred_element_type=jnp.float32)
    h1 = jnp.maximum(h1 + b1_ref[...], 0.0)

    # fc2 + ReLU.
    h2 = jnp.dot(h1.astype(w2_ref.dtype), w2_ref[...],
                 preferred_element_type=jnp.float32)
    h2 = jnp.maximum(h2 + b2_ref[...], 0.0)

    # q head: (B, fc2) @ (fc2, 1) would waste 255/256 of the MXU columns; do
    # it as a VPU multiply + lane reduction instead (wq stored as a (1, fc2)
    # row, f32).
    q = jnp.sum(h2 * wq_ref[...], axis=-1, keepdims=True) + bq_ref[...]
    q_ref[...] = q.astype(q_ref.dtype)


def _round_up(x, m):
    return ((x + m - 1) // m) * m


@functools.partial(jax.jit, static_argnames=("block_batch", "use_bf16_matmul"))
def critic_forward(state, action, params, *, block_batch=512,
                   use_bf16_matmul=False):
    """state: (B, input_dim), action: (B, n_agent*action_dim) -> q: (B, 1)."""
    w1s, w1a, b1, w2, b2, wq, bq = params
    B = state.shape[0]
    d_state = state.shape[1]
    d_action = action.shape[1]

    # Tile the batch axis.  TB must be a multiple of 8 (sublane) unless it
    # equals the (padded) batch; pad B up so the grid divides evenly and the
    # last tile is never ragged.
    tb = block_batch if B >= block_batch else _round_up(B, 8)
    b_pad = _round_up(B, tb)
    if b_pad != B:
        pad = ((0, b_pad - B), (0, 0))
        state = jnp.pad(state, pad)
        action = jnp.pad(action, pad)

    if use_bf16_matmul:
        # bf16 on the bandwidth-dominant x stream + fc weights; biases, the
        # q-head row and all elementwise math stay f32 (v5e has no bf16 VPU).
        state = state.astype(jnp.bfloat16)
        action = action.astype(jnp.bfloat16)
        w1s = w1s.astype(jnp.bfloat16)
        w1a = w1a.astype(jnp.bfloat16)
        w2 = w2.astype(jnp.bfloat16)

    grid = (b_pad // tb,)

    def batch_spec(cols):
        return pl.BlockSpec((tb, cols), lambda i: (i, 0))

    def resident_spec(shape):
        # Whole array, same block every grid step -> stays in VMEM.
        return pl.BlockSpec(shape, lambda i: (0, 0))

    q_pad = pl.pallas_call(
        critic_kernel,
        out_shape=jax.ShapeDtypeStruct((b_pad, 1), jnp.float32),
        grid=grid,
        in_specs=[
            batch_spec(d_state),            # state tile
            batch_spec(d_action),           # action tile
            resident_spec(w1s.shape),
            resident_spec(w1a.shape),
            resident_spec(b1.shape),
            resident_spec(w2.shape),
            resident_spec(b2.shape),
            resident_spec(wq.shape),
            resident_spec(bq.shape),
        ],
        out_specs=batch_spec(1),
        compiler_params=pltpu.CompilerParams(
            dimension_semantics=("parallel",),
        ),
    )(state, action, w1s, w1a, b1, w2, b2, wq, bq)

    return q_pad[:B]


def init_critic_params(key, input_dim, fc1_dims, fc2_dims, n_agent, action_dim):
    """Deterministic init mirroring nn.Linear default U(-1/sqrt(fan_in), ...).

    fc1's weight is stored split into (w1_state, w1_action); both halves use
    the full concatenated fan_in, exactly like the PyTorch layer.  wq is kept
    as a (1, fc2_dims) row for the VPU q-head.
    """
    d_act = n_agent * action_dim
    d_in = input_dim + d_act
    ks = jax.random.split(key, 7)

    def uniform(k, shape, fan_in):
        bound = 1.0 / (fan_in ** 0.5)
        return jax.random.uniform(k, shape, jnp.float32, -bound, bound)

    w1s = uniform(ks[0], (input_dim, fc1_dims), d_in)
    w1a = uniform(ks[1], (d_act, fc1_dims), d_in)
    b1 = uniform(ks[2], (1, fc1_dims), d_in)
    w2 = uniform(ks[3], (fc1_dims, fc2_dims), fc1_dims)
    b2 = uniform(ks[4], (1, fc2_dims), fc1_dims)
    wq = uniform(ks[5], (1, fc2_dims), fc2_dims)   # q-head row (VPU path)
    bq = uniform(ks[6], (1, 1), fc2_dims)
    return (w1s, w1a, b1, w2, b2, wq, bq)


if __name__ == "__main__":
    # Small shapes consistent with the module's forward.
    batch = 8
    input_dim = 32
    n_agent = 2
    action_dim = 4
    fc1_dims = 64
    fc2_dims = 32

    key = jax.random.PRNGKey(0)
    k_param, k_state, k_action = jax.random.split(key, 3)

    params = init_critic_params(k_param, input_dim, fc1_dims, fc2_dims,
                                n_agent, action_dim)
    state = jax.random.normal(k_state, (batch, input_dim), jnp.float32)
    action = jax.random.normal(k_action, (batch, n_agent * action_dim),
                               jnp.float32)

    q = critic_forward(state, action, params)
    jax.block_until_ready(q)

    # Pure-JAX reference (identical math to the PyTorch module).
    w1s, w1a, b1, w2, b2, wq, bq = params
    w1 = jnp.concatenate([w1s, w1a], axis=0)
    x = jnp.concatenate([state, action], axis=1)
    h1 = jnp.maximum(x @ w1 + b1, 0.0)
    h2 = jnp.maximum(h1 @ w2 + b2, 0.0)
    q_ref = h2 @ wq.T + bq
    assert q.shape == (batch, 1)
    assert jnp.allclose(q, q_ref, atol=1e-5, rtol=1e-5)

    print("KERNEL_OK")
</pallas_src>

<mosaic_0001>
module attributes {stable_mosaic.version = 11 : i64} {
  func.func @critic_kernel(%arg0: i32, %arg1: memref<8x32xf32, #tpu.memory_space<vmem>>, %arg2: memref<8x8xf32, #tpu.memory_space<vmem>>, %arg3: memref<32x64xf32, #tpu.memory_space<vmem>>, %arg4: memref<8x64xf32, #tpu.memory_space<vmem>>, %arg5: memref<1x64xf32, #tpu.memory_space<vmem>>, %arg6: memref<64x32xf32, #tpu.memory_space<vmem>>, %arg7: memref<1x32xf32, #tpu.memory_space<vmem>>, %arg8: memref<1x32xf32, #tpu.memory_space<vmem>>, %arg9: memref<1x1xf32, #tpu.memory_space<vmem>>, %arg10: memref<8x1xf32, #tpu.memory_space<vmem>>) attributes {dimension_semantics = [#tpu.dimension_semantics<parallel>], iteration_bounds = array<i64: 1>, scalar_prefetch = 0 : i64, scratch_operands = 0 : i64, tpu.core_type = #tpu.core_type<tc>, window_params = [{transform_indices = @transform_0, window_bounds = array<i64: 8, 32>}, {transform_indices = @transform_1, window_bounds = array<i64: 8, 8>}, {pipeline_mode = #tpu.pipeline_mode<synchronous>, transform_indices = @transform_2, window_bounds = array<i64: 32, 64>}, {pipeline_mode = #tpu.pipeline_mode<synchronous>, transform_indices = @transform_3, window_bounds = array<i64: 8, 64>}, {pipeline_mode = #tpu.pipeline_mode<synchronous>, transform_indices = @transform_4, window_bounds = array<i64: 1, 64>}, {pipeline_mode = #tpu.pipeline_mode<synchronous>, transform_indices = @transform_5, window_bounds = array<i64: 64, 32>}, {pipeline_mode = #tpu.pipeline_mode<synchronous>, transform_indices = @transform_6, window_bounds = array<i64: 1, 32>}, {pipeline_mode = #tpu.pipeline_mode<synchronous>, transform_indices = @transform_7, window_bounds = array<i64: 1, 32>}, {pipeline_mode = #tpu.pipeline_mode<synchronous>, transform_indices = @transform_8, window_bounds = array<i64: 1, 1>}, {transform_indices = @transform_9, window_bounds = array<i64: 8, 1>}]} {
    %c0 = arith.constant 0 : index
    %c0_0 = arith.constant 0 : index
    %0 = vector.load %arg1[%c0, %c0_0] : memref<8x32xf32, #tpu.memory_space<vmem>>, vector<8x32xf32>
    %c0_1 = arith.constant 0 : index
    %c0_2 = arith.constant 0 : index
    %1 = vector.load %arg3[%c0_1, %c0_2] : memref<32x64xf32, #tpu.memory_space<vmem>>, vector<32x64xf32>
    %cst = arith.constant dense<0.000000e+00> : vector<8x64xf32>
    %2 = tpu.matmul %0, %1, %cst {dimension_numbers = #tpu.dot_dimension_numbers<[1], [0], [0], [1], [0, 0, 1, 1], [], []>} : vector<8x32xf32>, vector<32x64xf32>, vector<8x64xf32> -> vector<8x64xf32>
    %c0_3 = arith.constant 0 : index
    %c0_4 = arith.constant 0 : index
    %3 = vector.load %arg2[%c0_3, %c0_4] : memref<8x8xf32, #tpu.memory_space<vmem>>, vector<8x8xf32>
    %c0_5 = arith.constant 0 : index
    %c0_6 = arith.constant 0 : index
    %4 = vector.load %arg4[%c0_5, %c0_6] : memref<8x64xf32, #tpu.memory_space<vmem>>, vector<8x64xf32>
    %cst_7 = arith.constant dense<0.000000e+00> : vector<8x64xf32>
    %5 = tpu.matmul %3, %4, %cst_7 {dimension_numbers = #tpu.dot_dimension_numbers<[1], [0], [0], [1], [0, 0, 1, 1], [], []>} : vector<8x8xf32>, vector<8x64xf32>, vector<8x64xf32> -> vector<8x64xf32>
    %6 = arith.addf %2, %5 : vector<8x64xf32>
    %c0_8 = arith.constant 0 : index
    %c0_9 = arith.constant 0 : index
    %7 = vector.load %arg5[%c0_8, %c0_9] : memref<1x64xf32, #tpu.memory_space<vmem>>, vector<1x64xf32>
    %8 = vector.broadcast %7 : vector<1x64xf32> to vector<8x64xf32>
    %9 = arith.addf %6, %8 : vector<8x64xf32>
    %cst_10 = arith.constant 0.000000e+00 : f32
    %10 = vector.broadcast %cst_10 : f32 to vector<8x64xf32>
    %11 = arith.maximumf %9, %10 : vector<8x64xf32>
    %c0_11 = arith.constant 0 : index
    %c0_12 = arith.constant 0 : index
    %12 = vector.load %arg6[%c0_11, %c0_12] : memref<64x32xf32, #tpu.memory_space<vmem>>, vector<64x32xf32>
    %cst_13 = arith.constant dense<0.000000e+00> : vector<8x32xf32>
    %13 = tpu.matmul %11, %12, %cst_13 {dimension_numbers = #tpu.dot_dimension_numbers<[1], [0], [0], [1], [0, 0, 1, 1], [], []>} : vector<8x64xf32>, vector<64x32xf32>, vector<8x32xf32> -> vector<8x32xf32>
    %c0_14 = arith.constant 0 : index
    %c0_15 = arith.constant 0 : index
    %14 = vector.load %arg7[%c0_14, %c0_15] : memref<1x32xf32, #tpu.memory_space<vmem>>, vector<1x32xf32>
    %15 = vector.broadcast %14 : vector<1x32xf32> to vector<8x32xf32>
    %16 = arith.addf %13, %15 : vector<8x32xf32>
    %cst_16 = arith.constant 0.000000e+00 : f32
    %17 = vector.broadcast %cst_16 : f32 to vector<8x32xf32>
    %18 = arith.maximumf %16, %17 : vector<8x32xf32>
    %c0_17 = arith.constant 0 : index
    %c0_18 = arith.constant 0 : index
    %19 = vector.load %arg8[%c0_17, %c0_18] : memref<1x32xf32, #tpu.memory_space<vmem>>, vector<1x32xf32>
    %20 = vector.broadcast %19 : vector<1x32xf32> to vector<8x32xf32>
    %21 = arith.mulf %18, %20 : vector<8x32xf32>
    %cst_19 = arith.constant dense<0.000000e+00> : vector<8xf32>
    %22 = vector.multi_reduction <add>, %21, %cst_19 [1] : vector<8x32xf32> to vector<8xf32>
    %23 = vector.shape_cast %22 : vector<8xf32> to vector<8x1xf32>
    %c0_20 = arith.constant 0 : index
    %c0_21 = arith.constant 0 : index
    %24 = vector.load %arg9[%c0_20, %c0_21] : memref<1x1xf32, #tpu.memory_space<vmem>>, vector<1x1xf32>
    %25 = vector.broadcast %24 : vector<1x1xf32> to vector<8x1xf32>
    %26 = arith.addf %23, %25 : vector<8x1xf32>
    %c0_22 = arith.constant 0 : index
    %c0_23 = arith.constant 0 : index
    %27 = vector.load %arg10[%c0_22, %c0_23] : memref<8x1xf32, #tpu.memory_space<vmem>>, vector<8x1xf32>
    tpu.vector_store %arg10[%c0_22, %c0_23], %26 {strides = array<i32>} : memref<8x1xf32, #tpu.memory_space<vmem>>, vector<8x1xf32>,
    return
  }
  func.func @transform_0(%arg0: i32) -> (i32, i32) {
    %c0_i32 = arith.constant 0 : i32
    %c0_i32_0 = arith.constant 0 : i32
    return %arg0, %c0_i32 : i32, i32
  }
  func.func @transform_1(%arg0: i32) -> (i32, i32) {
    %c0_i32 = arith.constant 0 : i32
    %c0_i32_0 = arith.constant 0 : i32
    return %arg0, %c0_i32 : i32, i32
  }
  func.func @transform_2(%arg0: i32) -> (i32, i32) {
    %c0_i32 = arith.constant 0 : i32
    %c0_i32_0 = arith.constant 0 : i32
    %c0_i32_1 = arith.constant 0 : i32
    return %c0_i32, %c0_i32_0 : i32, i32
  }
  func.func @transform_3(%arg0: i32) -> (i32, i32) {
    %c0_i32 = arith.constant 0 : i32
    %c0_i32_0 = arith.constant 0 : i32
    %c0_i32_1 = arith.constant 0 : i32
    return %c0_i32, %c0_i32_0 : i32, i32
  }
  func.func @transform_4(%arg0: i32) -> (i32, i32) {
    %c0_i32 = arith.constant 0 : i32
    %c0_i32_0 = arith.constant 0 : i32
    %c0_i32_1 = arith.constant 0 : i32
    return %c0_i32, %c0_i32_0 : i32, i32
  }
  func.func @transform_5(%arg0: i32) -> (i32, i32) {
    %c0_i32 = arith.constant 0 : i32
    %c0_i32_0 = arith.constant 0 : i32
    %c0_i32_1 = arith.constant 0 : i32
    return %c0_i32, %c0_i32_0 : i32, i32
  }
  func.func @transform_6(%arg0: i32) -> (i32, i32) {
    %c0_i32 = arith.constant 0 : i32
    %c0_i32_0 = arith.constant 0 : i32
    %c0_i32_1 = arith.constant 0 : i32
    return %c0_i32, %c0_i32_0 : i32, i32
  }
  func.func @transform_7(%arg0: i32) -> (i32, i32) {
    %c0_i32 = arith.constant 0 : i32
    %c0_i32_0 = arith.constant 0 : i32
    %c0_i32_1 = arith.constant 0 : i32
    return %c0_i32, %c0_i32_0 : i32, i32
  }
  func.func @transform_8(%arg0: i32) -> (i32, i32) {
    %c0_i32 = arith.constant 0 : i32
    %c0_i32_0 = arith.constant 0 : i32
    %c0_i32_1 = arith.constant 0 : i32
    return %c0_i32, %c0_i32_0 : i32, i32
  }
  func.func @transform_9(%arg0: i32) -> (i32, i32) {
    %c0_i32 = arith.constant 0 : i32
    %c0_i32_0 = arith.constant 0 : i32
    return %arg0, %c0_i32 : i32, i32
  }
}

</mosaic_0001>

<bundles_post_ra>
// kernel: critic_forward.1
= control target key start
LH: loop header
LB: loop body
LE: loop exit
PB: predicated region body
PF: predicated region fallthrough
CT: control target
= control target key end

     0   :  { %vm41_vm0 = vcmask 64512   ;;  %v373_v0 = vmov 0.0   ;;  %vm374_vm1 = vmmov 0   ;;  %vm115_vm2 = vcmask 261120   ;;  %s487_s3 = inlined_call_operand.vmem [shape: f32[8,64], index: 3, kind: input, shape index: {}]   ;;  %s488_s1 = inlined_call_operand.vmem [shape: f32[8,8], index: 1, kind: input, shape index: {}]   ;;  %s489_s2 = inlined_call_operand.vmem [shape: f32[32,64], index: 2, kind: input, shape index: {}]   ;;  %s490_s0 = inlined_call_operand.vmem [shape: f32[8,32], index: 0, kind: input, shape index: {}]   ;;  %s491_s5 = inlined_call_operand.vmem [shape: f32[64,32], index: 5, kind: input, shape index: {}]   ;;  %s492_s4 = inlined_call_operand.vmem [shape: f32[1,64], index: 4, kind: input, shape index: {}]   ;;  %s493_s8 = inlined_call_operand.<no memory space> [shape: f32[1,1], index: 8, kind: input, shape index: {}]   ;;  %s494_s6 = inlined_call_operand.vmem [shape: f32[1,32], index: 6, kind: input, shape index: {}]   ;;  %s495_s7 = inlined_call_operand.vmem [shape: f32[1,32], index: 7, kind: input, shape index: {}]   ;;  %s496_s9 = inlined_call_operand.vmem [shape: f32[8,1], index: 9, kind: output, shape index: {}]  }
   0x1   :  { %336 = vmatprep.subr.mxu1 %v373_v0  ;;  %v40_v1 = vld [vmem:[%s487_s3] sm:$0xff]  ;;  %338 = vmatprep.mubr.msk.f32.mxu1 %vm374_vm1, %v373_v0  ;;  %v38_v3 = vld [vmem:[%s489_s2 + $0x18] sm:$0xff]  ;;  %v37_v4 = vld [vmem:[%s489_s2 + $0x10] sm:$0xff]  ;;  %vm213_vm3 = vcmask 523264   ;;  %v14_v24 = vstv %s493_s8  ;;  %vm307_vm4 = vcmask 7168  }
   0x2   :  { %v39_v2 = vld [vmem:[%s488_s1] sm:$0xff]  ;;  %337 = vmatpush3.msra.mxu1 %v40_v1  ;;  %352 = vmatprep.subr.mxu0 %v373_v0  ;;  %v36_v5 = vld [vmem:[%s489_s2 + $0x8] sm:$0xff]  ;;  %v205_v8 = vld [vmem:[%s491_s5 + $0x38] sm:$0xff]  ;;  %15 = vst [vmem:[#allocation2] sm:$0x1] %v14_v24 }
   0x3   :  { %339 = vmatmul.mubr.msk.f32.vlgmr.msra.gmra.mxu1 %vm41_vm0, %v39_v2  ;;  %341 = vmatprep.subr.mxu1 %v373_v0  ;;  %v35_v6 = vld [vmem:[%s489_s2] sm:$0xff]  ;;  %v204_v9 = vld [vmem:[%s491_s5 + $0x30] sm:$0xff]  ;;  %v203_v10 = vld [vmem:[%s491_s5 + $0x28] sm:$0xff] }
   0x4   :  { %342 = vmatpush3.msra.mxu1 %v38_v3  ;;  %349 = vmatprep.mubr.msk.f32.mxu1 %vm374_vm1, %v373_v0  ;;  %v34_v7 = vld [vmem:[%s490_s0] sm:$0xff]  ;;  %v201_v12 = vld [vmem:[%s491_s5 + $0x18] sm:$0xff]  ;;  %v200_v13 = vld [vmem:[%s491_s5 + $0x10] sm:$0xff] }
   0x5   :  { %343 = vmatprep.subr.mxu1 %v373_v0  ;;  %368 = vmatprep.mubr.msk.f32.mxu0 %vm374_vm1, %v373_v0  ;;  %v202_v11 = vld [vmem:[%s491_s5 + $0x20] sm:$0xff]  ;;  %v199_v14 = vld [vmem:[%s491_s5 + $0x8] sm:$0xff] }
   0x6   :  { %344 = vmatpush3.msra.mxu1 %v37_v4  ;;  %353 = vmatpush3.msra.mxu0 %v205_v8  ;;  %v198_v15 = vld [vmem:[%s491_s5] sm:$0xff] }
   0x7   :  { %345 = vmatprep.subr.mxu1 %v373_v0  ;;  %354 = vmatprep.subr.mxu0 %v373_v0  ;;  %v315_v19 = vld [vmem:[%s492_s4] ss:$0 sm:$0xff] }
   0x8   :  { %346 = vmatpush3.msra.mxu1 %v36_v5  ;;  %355 = vmatpush3.msra.mxu0 %v204_v9  ;;  %v316_v25 = vld [vmem:[%s494_s6] ss:$0 sm:$0xff] }
   0x9   :  { %347 = vmatprep.subr.mxu1 %v373_v0  ;;  %356 = vmatprep.subr.mxu0 %v373_v0  ;;  %v318_v29 = vld [vmem:[%s495_s7] ss:$0 sm:$0xff] }
   0xa   :  { %348 = vmatpush3.msra.mxu1 %v35_v6  ;;  %357 = vmatpush3.msra.mxu0 %v203_v10  ;;  %v319_v33 = vld [vmem:[#allocation2] ss:$0 sm:$0xff] }
   0xb   :  { %350 = vmatmul.mubr.msk.f32.vlgmr.msra.gmra.mxu1 %vm115_vm2, %v34_v7  ;;  %358 = vmatprep.subr.mxu0 %v373_v0 }
   0xc   :  { %359 = vmatpush3.msra.mxu0 %v202_v11 }
   0xd   :  { %360 = vmatprep.subr.mxu0 %v373_v0 }
   0xe   :  { %361 = vmatpush3.msra.mxu0 %v201_v12 }
   0xf   :  { %362 = vmatprep.subr.mxu0 %v373_v0 }
  0x10   :  { %363 = vmatpush3.msra.mxu0 %v200_v13 }
  0x11   :  { %364 = vmatprep.subr.mxu0 %v373_v0 }
  0x12   :  { %365 = vmatpush3.msra.mxu0 %v199_v14 }
  0x13   :  { %366 = vmatprep.subr.mxu0 %v373_v0 }
  0x14   :  { %367 = vmatpush3.msra.mxu0 %v198_v15 }
  0xc3   :  { %v111_v16 = vpop.f32.mrf.mxu1 }
  0xc5   :  { %v340_v17 = vpop.f32.mrf.mxu1 }
  0xcb   :  { %v185_v18 = vpop.f32.mrf.mxu1 }
  0xcc   :  { %v186_v20 = vadd.f32 %v185_v18, %v111_v16 }
  0xcd   :  { %v351_v21 = vpop.f32.mrf.mxu1 }
  0xce   :  { %v196_v22 = vadd.f32 %v315_v19, %v186_v20 }
  0xd0   :  { %v197_v23 = vmax.f32 %v196_v22, 0.0 }
  0xd2   :  { %369 = vmatmul.mubr.msk.f32.vlgmr.msra.gmra.mxu0 %vm213_vm3, %v197_v23 }
 0x192   :  { %v283_v26 = vpop.f32.mrf.mxu0 }
 0x193   :  { %v284_v27 = vadd.f32 %v316_v25, %v283_v26 }
 0x194   :  { %v370_v28 = vpop.f32.mrf.mxu0 }
 0x195   :  { %v287_v30 = vmax.f32 %v284_v27, 0.0 }
 0x197   :  { %v295_v31 = vmul.f32 %v318_v29, %v287_v30 }
 0x199   :  { %v296_v32 = vsel %vm115_vm2, %v295_v31, 0.0 }
 0x19a   :  { %297 = vadd.xlane.f32.xlu0 %v296_v32 }
 0x223   :  { %v298_v34 = vpop.xlane.xlu0 %297 }
 0x224   :  { %v306_v35 = vadd.f32 %v319_v33, %v298_v34 }
 0x226   :  { %308 = vst.msk [vmem:[%s496_s9] sm:$0xff] %vm307_vm4, %v306_v35 }

</bundles_post_ra>
